<compile_context>
chip_gen: v6e
topology: v6e:2x2x1
jax: 0.10.0
libtpu: 0.0.40
codegen_flags: <defaults>
</compile_context>

<pallas_src>
import functools

import jax
import jax.numpy as jnp
from jax import lax
from jax.experimental import pallas as pl
from jax.experimental.pallas import tpu as pltpu

# ---- small shapes consistent with the module (defaults 128/512 scaled down) ----
B = 2
C_IN = 8        # module default in_ch=128
C_OUT = 16      # module default out_ch=512
T = 16
KERNEL = 9
PAD = 4
H = C_OUT // 2  # LSTM hidden size per direction
BN_EPS = 1e-5

TT = 8            # prenet time-tile (frames per grid step)
LSTM_UNROLL = 4   # bounded unroll of the recurrence (full unroll explodes at prod T)

assert T % TT == 0, "TODO(synk): ragged last time tile not handled"
assert TT >= PAD and TT >= KERNEL - 1 and (TT * B) % 8 == 0


# ====================== prenet pass A: tiled Conv1d + BN statistics ======================
# Layout: activations are time-major channels-last slabs, row r = frame*B + b.
#   xc_ref / xn_ref : (TT*B, Cin) bf16  current tile / next tile (forward halo source)
#                     of the time-PADDED input slab ((nT+1)*TT frames).
#   w_ref           : (K*Cin, Cout) bf16, row k*Cin + c = w[o, c, k]
#   y_ref           : (TT*B, Cout) f32 raw (pre-BN) conv output for this tile
#   stats_ref       : (2, Cout) f32 accumulator output: [sum; sum of squares]
def conv_stats_kernel(xc_ref, xn_ref, w_ref, y_ref, stats_ref, *, k_taps, batch):
    i = pl.program_id(0)
    rows = y_ref.shape[0]                 # TT * B
    cin = xc_ref.shape[1]
    cout = y_ref.shape[1]
    halo = (k_taps - 1) * batch

    # current tile + K-1 frame forward halo from the next tile
    win = jnp.concatenate([xc_ref[...], xn_ref[:halo, :]], axis=0)

    # K-tap accumulation (no im2col patch slab); bf16 operands, f32 accumulation.
    acc = jnp.zeros((rows, cout), jnp.float32)
    for k in range(k_taps):
        acc = acc + jnp.dot(win[k * batch:k * batch + rows, :],
                            w_ref[k * cin:(k + 1) * cin, :],
                            preferred_element_type=jnp.float32)
    # Conv bias omitted: cancelled exactly by training-mode BN mean subtraction.
    y_ref[...] = acc

    # running per-channel sum / sum-of-squares for two-pass BatchNorm
    @pl.when(i == 0)
    def _():
        stats_ref[...] = jnp.zeros_like(stats_ref)

    stats_ref[...] += jnp.concatenate(
        [jnp.sum(acc, axis=0, keepdims=True),
         jnp.sum(acc * acc, axis=0, keepdims=True)], axis=0)


# =============== prenet pass B: tiled BN(scale/shift) + ReLU + re-pad (bf16) ===============
#   yp_ref / yc_ref : (TT*B, Cout) f32 raw conv tiles j-1 / j (clamped) of the unpadded output
#   sc_ref / sh_ref : (1, Cout) folded BN scale / shift
#   o_ref           : (TT*B, Cout) bf16 tile j of the time-PADDED activated slab
def bn_relu_pad_kernel(yp_ref, yc_ref, sc_ref, sh_ref, o_ref, *, tt, batch, pad, t_len):
    j = pl.program_id(0)
    rows = tt * batch
    head = (tt - pad) * batch
    # padded-output tile j = real frames [j*tt - pad, (j+1)*tt - pad):
    #   last `pad` frames of raw tile j-1  ++  first tt-pad frames of raw tile j
    win = jnp.concatenate([yp_ref[head:, :], yc_ref[:head, :]], axis=0)
    act = jnp.maximum(win * sc_ref[...] + sh_ref[...], 0.0)
    # zero the time-padding rows (frames outside [0, T))
    ridx = lax.broadcasted_iota(jnp.int32, (rows, 1), 0)
    frame = j * tt - pad + ridx // batch
    act = jnp.where((frame >= 0) & (frame < t_len), act, 0.0)
    o_ref[...] = act.astype(o_ref.dtype)


def conv_block_pass(x_pad, w, gamma, beta):
    """Tiled conv + BN statistics. x_pad: ((nT+1)*TT*B, Cin) bf16 padded slab."""
    cout, cin, k = w.shape
    nT = T // TT
    w2 = jnp.transpose(w, (2, 1, 0)).reshape(k * cin, cout).astype(jnp.bfloat16)

    y_raw, stats = pl.pallas_call(
        functools.partial(conv_stats_kernel, k_taps=k, batch=B),
        out_shape=(jax.ShapeDtypeStruct((T * B, cout), jnp.float32),
                   jax.ShapeDtypeStruct((2, cout), jnp.float32)),
        grid=(nT,),
        in_specs=[pl.BlockSpec((TT * B, cin), lambda i: (i, 0)),
                  pl.BlockSpec((TT * B, cin), lambda i: (i + 1, 0)),   # forward halo tile
                  pl.BlockSpec((k * cin, cout), lambda i: (0, 0))],
        out_specs=(pl.BlockSpec((TT * B, cout), lambda i: (i, 0)),
                   pl.BlockSpec((2, cout), lambda i: (0, 0))),
        compiler_params=pltpu.CompilerParams(
            dimension_semantics=("arbitrary",)),
    )(x_pad, x_pad, w2)

    # fold BN (training mode) into one scale/shift (tiny XLA math on (Cout,) vectors)
    n = B * T
    mean = stats[0] / n
    var = jnp.maximum(stats[1] / n - mean * mean, 0.0)
    scale = gamma * lax.rsqrt(var + BN_EPS)
    shift = beta - mean * scale
    return y_raw, scale.reshape(1, cout), shift.reshape(1, cout)


def bn_relu_repad(y_raw, scale, shift):
    """Tiled normalize+ReLU; emits the bf16 time-padded slab for the next conv block."""
    cout = y_raw.shape[1]
    nT = T // TT
    return pl.pallas_call(
        functools.partial(bn_relu_pad_kernel, tt=TT, batch=B, pad=PAD, t_len=T),
        out_shape=jax.ShapeDtypeStruct(((nT + 1) * TT * B, cout), jnp.bfloat16),
        grid=(nT + 1,),
        in_specs=[pl.BlockSpec((TT * B, cout), lambda j: (jnp.maximum(j - 1, 0), 0)),
                  pl.BlockSpec((TT * B, cout), lambda j: (jnp.minimum(j, nT - 1), 0)),
                  pl.BlockSpec((1, cout), lambda j: (0, 0)),
                  pl.BlockSpec((1, cout), lambda j: (0, 0))],
        out_specs=pl.BlockSpec((TT * B, cout), lambda j: (j, 0)),
        compiler_params=pltpu.CompilerParams(
            dimension_semantics=("parallel",)),
    )(y_raw, y_raw, scale, shift)


def prenet_forward(mel, prenet_params):
    """3 x (Conv1d + BatchNorm1d(train) + ReLU); block 3's BN+ReLU is fused into the LSTM."""
    nT = T // TT
    x = jnp.transpose(mel.astype(jnp.float32), (2, 0, 1))            # (T, B, Cin)
    x = jnp.pad(x, ((PAD, (nT + 1) * TT - T - PAD), (0, 0), (0, 0)))
    x = x.reshape((nT + 1) * TT * B, C_IN).astype(jnp.bfloat16)

    p1, p2, p3 = prenet_params
    y1, s1, b1 = conv_block_pass(x, p1['w'], p1['gamma'], p1['beta'])
    a1 = bn_relu_repad(y1, s1, b1)
    y2, s2, b2 = conv_block_pass(a1, p2['w'], p2['gamma'], p2['beta'])
    a2 = bn_relu_repad(y2, s2, b2)
    y3, s3, b3 = conv_block_pass(a2, p3['w'], p3['gamma'], p3['beta'])
    return y3, s3, b3                       # raw conv3 + folded BN3 (applied in LSTM)


# ===================== bidirectional LSTM: both directions per time step =====================
#   y3_ref : (T*B, C) f32 raw conv3 output; BN3+ReLU applied here (fused, no HBM round trip)
#   wih_ref: (C, 8H) bf16 [W_ih_fwd^T | W_ih_bwd^T]
#   whh*_  : (H, 4H) bf16 per-direction W_hh^T
#   b_ref  : (1, 8H) f32 (b_ih + b_hh) of both directions
#   y_ref  : (T, B, 2H) f32: fwd half [:H], bwd half [H:]
#   gx_ref : VMEM scratch (T*B, 8H) f32: hoisted input projection, one GEMM, one store
def bilstm_kernel(y3_ref, sc_ref, sh_ref, wih_ref, whhf_ref, whhb_ref, b_ref,
                  h0_ref, c0_ref, y_ref, hn_ref, cn_ref, gx_ref):
    Tt, Bb, H2 = y_ref.shape
    Hh = H2 // 2

    # fused prenet block-3 BN + ReLU (f32), then bf16 MXU operand
    x = jnp.maximum(y3_ref[...] * sc_ref[...] + sh_ref[...], 0.0)
    gx_ref[...] = jnp.dot(x.astype(jnp.bfloat16), wih_ref[...],
                          preferred_element_type=jnp.float32) + b_ref[...]
    whh_f = whhf_ref[...]
    whh_b = whhb_ref[...]

    def lstm_cell(gx_t, h, c, whh):
        g = gx_t + jnp.dot(h.astype(jnp.bfloat16), whh,
                           preferred_element_type=jnp.float32)
        # PyTorch gate order: input, forget, cell, output (all f32 EUP/VPU math)
        ig = jax.nn.sigmoid(g[:, 0:Hh])
        fg = jax.nn.sigmoid(g[:, Hh:2 * Hh])
        gg = jnp.tanh(g[:, 2 * Hh:3 * Hh])
        og = jax.nn.sigmoid(g[:, 3 * Hh:4 * Hh])
        c_new = fg * c + ig * gg
        h_new = og * jnp.tanh(c_new)
        return h_new, c_new

    def step(i, carry):
        hf, cf, hb, cb = carry
        tf = i
        tb = Tt - 1 - i                                   # in-kernel time reversal
        rf = pl.multiple_of(tf * Bb, Bb)
        rb = pl.multiple_of(tb * Bb, Bb)
        # the two directions' independent matmuls are issued back-to-back so the
        # scheduler can overlap them (MXU drain hiding on single-TC v5e/v6e)
        hf, cf = lstm_cell(gx_ref[pl.ds(rf, Bb), 0:4 * Hh], hf, cf, whh_f)
        hb, cb = lstm_cell(gx_ref[pl.ds(rb, Bb), 4 * Hh:8 * Hh], hb, cb, whh_b)
        y_ref[tf, :, 0:Hh] = hf
        y_ref[tb, :, Hh:2 * Hh] = hb
        return (hf, cf, hb, cb)

    hf, cf, hb, cb = lax.fori_loop(
        0, Tt, step, (h0_ref[0], c0_ref[0], h0_ref[1], c0_ref[1]),
        unroll=LSTM_UNROLL)
    hn_ref[0] = hf
    hn_ref[1] = hb
    cn_ref[0] = cf
    cn_ref[1] = cb


def bilstm(y3_raw, s3, b3, p_fwd, p_bwd, h0, c0):
    C = y3_raw.shape[1]
    Hh = p_fwd['w_hh'].shape[1]
    # pre-transpose / concatenate direction weights in the wrapper (free at param prep)
    wih = jnp.concatenate([p_fwd['w_ih'].T, p_bwd['w_ih'].T],
                          axis=1).astype(jnp.bfloat16)                 # (C, 8H)
    whh_f = p_fwd['w_hh'].T.astype(jnp.bfloat16)                        # (H, 4H)
    whh_b = p_bwd['w_hh'].T.astype(jnp.bfloat16)
    bias = jnp.concatenate([p_fwd['b_ih'] + p_fwd['b_hh'],
                            p_bwd['b_ih'] + p_bwd['b_hh']]).reshape(1, 8 * Hh)

    return pl.pallas_call(
        bilstm_kernel,
        out_shape=(jax.ShapeDtypeStruct((T, B, 2 * Hh), jnp.float32),
                   jax.ShapeDtypeStruct((2, B, Hh), jnp.float32),
                   jax.ShapeDtypeStruct((2, B, Hh), jnp.float32)),
        grid=(1,),
        in_specs=[
            pl.BlockSpec((T * B, C), lambda i: (0, 0)),
            pl.BlockSpec((1, C), lambda i: (0, 0)),
            pl.BlockSpec((1, C), lambda i: (0, 0)),
            pl.BlockSpec((C, 8 * Hh), lambda i: (0, 0)),
            pl.BlockSpec((Hh, 4 * Hh), lambda i: (0, 0)),
            pl.BlockSpec((Hh, 4 * Hh), lambda i: (0, 0)),
            pl.BlockSpec((1, 8 * Hh), lambda i: (0, 0)),
            pl.BlockSpec((2, B, Hh), lambda i: (0, 0, 0)),
            pl.BlockSpec((2, B, Hh), lambda i: (0, 0, 0)),
        ],
        out_specs=(pl.BlockSpec((T, B, 2 * Hh), lambda i: (0, 0, 0)),
                   pl.BlockSpec((2, B, Hh), lambda i: (0, 0, 0)),
                   pl.BlockSpec((2, B, Hh), lambda i: (0, 0, 0))),
        scratch_shapes=[pltpu.VMEM((T * B, 8 * Hh), jnp.float32)],
        compiler_params=pltpu.CompilerParams(
            dimension_semantics=("arbitrary",)),
    )(y3_raw, s3, b3, wih, whh_f, whh_b, bias, h0, c0)


# ================================ mel_encoder forward ================================
def mel_encoder_forward(mel, params, hidden=None, length=None):
    # TODO(synk): pack_padded_sequence / variable-length masking has no clean Pallas
    # equivalent here; full-length sequences are assumed (length=None).  nn.LSTM dropout
    # with num_layers=1 is a no-op in PyTorch and is omitted.
    Bb = mel.shape[0]
    y3, s3, b3 = prenet_forward(mel, params['prenet'])
    if hidden is None:
        h0 = jnp.zeros((2, Bb, H), jnp.float32)
        c0 = jnp.zeros((2, Bb, H), jnp.float32)
    else:
        h0, c0 = hidden
    y_tbd, h_n, c_n = bilstm(y3, s3, b3, params['lstm_fwd'], params['lstm_bwd'], h0, c0)
    y = jnp.transpose(y_tbd, (1, 0, 2))          # (T, B, 2H) -> (B, T, 2H) batch-first
    return y, (h_n, c_n)


# =============================== deterministic params ===============================
def init_params(key):
    ks = iter(jax.random.split(key, 32))

    def nrm(shape, scale=0.1):
        return (scale * jax.random.normal(next(ks), shape)).astype(jnp.float32)

    prenet = []
    for cin, cout in [(C_IN, C_OUT), (C_OUT, C_OUT), (C_OUT, C_OUT)]:
        prenet.append(dict(w=nrm((cout, cin, KERNEL)), b=nrm((cout,)),
                           gamma=1.0 + nrm((cout,)), beta=nrm((cout,))))

    def lstm_p():
        return dict(w_ih=nrm((4 * H, C_OUT)), w_hh=nrm((4 * H, H)),
                    b_ih=nrm((4 * H,)), b_hh=nrm((4 * H,)))

    return dict(prenet=prenet, lstm_fwd=lstm_p(), lstm_bwd=lstm_p())


# ================================ pure-JAX reference ================================
# The reference casts matmul operands to bf16 (f32 accumulation) to mirror the
# MXU-native precision used by the kernels; all other math stays f32.
def ref_conv_block(x, w, b, gamma, beta):
    Bb, Cin, Tt = x.shape
    Cout, _, K = w.shape
    xp = jnp.pad(x, ((0, 0), (0, 0), (PAD, PAD))).astype(jnp.bfloat16)
    wb = w.astype(jnp.bfloat16)
    y = jnp.zeros((Bb, Cout, Tt), jnp.float32)
    for k in range(K):
        y = y + jnp.einsum('bct,oc->bot', xp[:, :, k:k + Tt], wb[:, :, k],
                           preferred_element_type=jnp.float32)
    y = y + b[None, :, None]
    mean = y.mean(axis=(0, 2), keepdims=True)
    var = ((y - mean) ** 2).mean(axis=(0, 2), keepdims=True)
    y = (y - mean) / jnp.sqrt(var + BN_EPS) * gamma[None, :, None] + beta[None, :, None]
    return jnp.maximum(y, 0.0)


def ref_lstm_dir(x_tbc, p, h0, c0):
    wih_t = p['w_ih'].T.astype(jnp.bfloat16)
    whh_t = p['w_hh'].T.astype(jnp.bfloat16)
    bias = p['b_ih'] + p['b_hh']

    def step(carry, x_t):
        h, c = carry
        gates = (jnp.dot(x_t.astype(jnp.bfloat16), wih_t,
                         preferred_element_type=jnp.float32)
                 + jnp.dot(h.astype(jnp.bfloat16), whh_t,
                           preferred_element_type=jnp.float32)
                 + bias)
        i, f, g, o = jnp.split(gates, 4, axis=-1)
        c = jax.nn.sigmoid(f) * c + jax.nn.sigmoid(i) * jnp.tanh(g)
        h = jax.nn.sigmoid(o) * jnp.tanh(c)
        return (h, c), h

    (h, c), ys = lax.scan(step, (h0, c0), x_tbc)
    return ys, h, c


def ref_forward(mel, params):
    x = mel.astype(jnp.float32)
    for blk in params['prenet']:
        x = ref_conv_block(x, blk['w'], blk['b'], blk['gamma'], blk['beta'])
    x_tbc = jnp.transpose(x, (2, 0, 1))
    Bb = x.shape[0]
    h0 = jnp.zeros((2, Bb, H), jnp.float32)
    c0 = jnp.zeros((2, Bb, H), jnp.float32)
    yf, hf, cf = ref_lstm_dir(x_tbc, params['lstm_fwd'], h0[0], c0[0])
    yb_r, hb, cb = ref_lstm_dir(x_tbc[::-1], params['lstm_bwd'], h0[1], c0[1])
    yb = yb_r[::-1]
    y = jnp.transpose(jnp.concatenate([yf, yb], axis=-1), (1, 0, 2))
    return y, (jnp.stack([hf, hb]), jnp.stack([cf, cb]))


if __name__ == "__main__":
    key = jax.random.PRNGKey(0)
    kp, kx = jax.random.split(key)
    params = init_params(kp)
    mel = jax.random.normal(kx, (B, C_IN, T), dtype=jnp.float32)

    y, (h_n, c_n) = mel_encoder_forward(mel, params, hidden=None)
    jax.block_until_ready((y, h_n, c_n))

    y_ref, (h_ref, c_ref) = ref_forward(mel, params)
    assert y.shape == (B, T, 2 * H) and h_n.shape == (2, B, H) and c_n.shape == (2, B, H)
    assert jnp.allclose(y, y_ref, atol=1e-3, rtol=1e-3)
    assert jnp.allclose(h_n, h_ref, atol=1e-3, rtol=1e-3)
    assert jnp.allclose(c_n, c_ref, atol=1e-3, rtol=1e-3)
    print("KERNEL_OK")
</pallas_src>

<mosaic_0001>
module attributes {stable_mosaic.version = 11 : i64} {
  func.func @conv_stats_kernel(%arg0: i32, %arg1: memref<16x8xbf16, #tpu.memory_space<vmem>>, %arg2: memref<16x8xbf16, #tpu.memory_space<vmem>>, %arg3: memref<72x16xbf16, #tpu.memory_space<vmem>>, %arg4: memref<16x16xf32, #tpu.memory_space<vmem>>, %arg5: memref<2x16xf32, #tpu.memory_space<vmem>>) attributes {dimension_semantics = [#tpu.dimension_semantics<arbitrary>], iteration_bounds = array<i64: 2>, scalar_prefetch = 0 : i64, scratch_operands = 0 : i64, tpu.core_type = #tpu.core_type<tc>, window_params = [{transform_indices = @transform_0, window_bounds = array<i64: 16, 8>}, {transform_indices = @transform_1, window_bounds = array<i64: 16, 8>}, {pipeline_mode = #tpu.pipeline_mode<synchronous>, transform_indices = @transform_2, window_bounds = array<i64: 72, 16>}, {transform_indices = @transform_3, window_bounds = array<i64: 16, 16>}, {pipeline_mode = #tpu.pipeline_mode<synchronous>, transform_indices = @transform_4, window_bounds = array<i64: 2, 16>}]} {
    %c0 = arith.constant 0 : index
    %c0_0 = arith.constant 0 : index
    %0 = vector.load %arg1[%c0, %c0_0] : memref<16x8xbf16, #tpu.memory_space<vmem>>, vector<16x8xbf16>
    %c0_1 = arith.constant 0 : index
    %c0_2 = arith.constant 0 : index
    %1 = vector.load %arg2[%c0_1, %c0_2] : memref<16x8xbf16, #tpu.memory_space<vmem>>, vector<16x8xbf16>
    %2 = tpu.concatenate %0, %1 in 0 : vector<16x8xbf16>, vector<16x8xbf16> -> vector<32x8xbf16>
    %cst = arith.constant 0.000000e+00 : f32
    %3 = vector.broadcast %cst : f32 to vector<16x16xf32>
    %4 = vector.extract_strided_slice %2 {offsets = [0, 0], sizes = [16, 8], strides = [1, 1]} : vector<32x8xbf16> to vector<16x8xbf16>
    %c0_3 = arith.constant 0 : index
    %c0_4 = arith.constant 0 : index
    %5 = vector.load %arg3[%c0_3, %c0_4] : memref<72x16xbf16, #tpu.memory_space<vmem>>, vector<8x16xbf16>
    %cst_5 = arith.constant dense<0.000000e+00> : vector<16x16xf32>
    %6 = tpu.matmul %4, %5, %cst_5 {dimension_numbers = #tpu.dot_dimension_numbers<[1], [0], [0], [1], [0, 0, 1, 1], [], []>} : vector<16x8xbf16>, vector<8x16xbf16>, vector<16x16xf32> -> vector<16x16xf32>
    %7 = arith.addf %3, %6 : vector<16x16xf32>
    %8 = vector.extract_strided_slice %2 {offsets = [2, 0], sizes = [16, 8], strides = [1, 1]} : vector<32x8xbf16> to vector<16x8xbf16>
    %c8 = arith.constant 8 : index
    %c0_6 = arith.constant 0 : index
    %9 = vector.load %arg3[%c8, %c0_6] : memref<72x16xbf16, #tpu.memory_space<vmem>>, vector<8x16xbf16>
    %cst_7 = arith.constant dense<0.000000e+00> : vector<16x16xf32>
    %10 = tpu.matmul %8, %9, %cst_7 {dimension_numbers = #tpu.dot_dimension_numbers<[1], [0], [0], [1], [0, 0, 1, 1], [], []>} : vector<16x8xbf16>, vector<8x16xbf16>, vector<16x16xf32> -> vector<16x16xf32>
    %11 = arith.addf %7, %10 : vector<16x16xf32>
    %12 = vector.extract_strided_slice %2 {offsets = [4, 0], sizes = [16, 8], strides = [1, 1]} : vector<32x8xbf16> to vector<16x8xbf16>
    %c16 = arith.constant 16 : index
    %c0_8 = arith.constant 0 : index
    %13 = vector.load %arg3[%c16, %c0_8] : memref<72x16xbf16, #tpu.memory_space<vmem>>, vector<8x16xbf16>
    %cst_9 = arith.constant dense<0.000000e+00> : vector<16x16xf32>
    %14 = tpu.matmul %12, %13, %cst_9 {dimension_numbers = #tpu.dot_dimension_numbers<[1], [0], [0], [1], [0, 0, 1, 1], [], []>} : vector<16x8xbf16>, vector<8x16xbf16>, vector<16x16xf32> -> vector<16x16xf32>
    %15 = arith.addf %11, %14 : vector<16x16xf32>
    %16 = vector.extract_strided_slice %2 {offsets = [6, 0], sizes = [16, 8], strides = [1, 1]} : vector<32x8xbf16> to vector<16x8xbf16>
    %c24 = arith.constant 24 : index
    %c0_10 = arith.constant 0 : index
    %17 = vector.load %arg3[%c24, %c0_10] : memref<72x16xbf16, #tpu.memory_space<vmem>>, vector<8x16xbf16>
    %cst_11 = arith.constant dense<0.000000e+00> : vector<16x16xf32>
    %18 = tpu.matmul %16, %17, %cst_11 {dimension_numbers = #tpu.dot_dimension_numbers<[1], [0], [0], [1], [0, 0, 1, 1], [], []>} : vector<16x8xbf16>, vector<8x16xbf16>, vector<16x16xf32> -> vector<16x16xf32>
    %19 = arith.addf %15, %18 : vector<16x16xf32>
    %20 = vector.extract_strided_slice %2 {offsets = [8, 0], sizes = [16, 8], strides = [1, 1]} : vector<32x8xbf16> to vector<16x8xbf16>
    %c32 = arith.constant 32 : index
    %c0_12 = arith.constant 0 : index
    %21 = vector.load %arg3[%c32, %c0_12] : memref<72x16xbf16, #tpu.memory_space<vmem>>, vector<8x16xbf16>
    %cst_13 = arith.constant dense<0.000000e+00> : vector<16x16xf32>
    %22 = tpu.matmul %20, %21, %cst_13 {dimension_numbers = #tpu.dot_dimension_numbers<[1], [0], [0], [1], [0, 0, 1, 1], [], []>} : vector<16x8xbf16>, vector<8x16xbf16>, vector<16x16xf32> -> vector<16x16xf32>
    %23 = arith.addf %19, %22 : vector<16x16xf32>
    %24 = vector.extract_strided_slice %2 {offsets = [10, 0], sizes = [16, 8], strides = [1, 1]} : vector<32x8xbf16> to vector<16x8xbf16>
    %c40 = arith.constant 40 : index
    %c0_14 = arith.constant 0 : index
    %25 = vector.load %arg3[%c40, %c0_14] : memref<72x16xbf16, #tpu.memory_space<vmem>>, vector<8x16xbf16>
    %cst_15 = arith.constant dense<0.000000e+00> : vector<16x16xf32>
    %26 = tpu.matmul %24, %25, %cst_15 {dimension_numbers = #tpu.dot_dimension_numbers<[1], [0], [0], [1], [0, 0, 1, 1], [], []>} : vector<16x8xbf16>, vector<8x16xbf16>, vector<16x16xf32> -> vector<16x16xf32>
    %27 = arith.addf %23, %26 : vector<16x16xf32>
    %28 = vector.extract_strided_slice %2 {offsets = [12, 0], sizes = [16, 8], strides = [1, 1]} : vector<32x8xbf16> to vector<16x8xbf16>
    %c48 = arith.constant 48 : index
    %c0_16 = arith.constant 0 : index
    %29 = vector.load %arg3[%c48, %c0_16] : memref<72x16xbf16, #tpu.memory_space<vmem>>, vector<8x16xbf16>
    %cst_17 = arith.constant dense<0.000000e+00> : vector<16x16xf32>
    %30 = tpu.matmul %28, %29, %cst_17 {dimension_numbers = #tpu.dot_dimension_numbers<[1], [0], [0], [1], [0, 0, 1, 1], [], []>} : vector<16x8xbf16>, vector<8x16xbf16>, vector<16x16xf32> -> vector<16x16xf32>
    %31 = arith.addf %27, %30 : vector<16x16xf32>
    %32 = vector.extract_strided_slice %2 {offsets = [14, 0], sizes = [16, 8], strides = [1, 1]} : vector<32x8xbf16> to vector<16x8xbf16>
    %c56 = arith.constant 56 : index
    %c0_18 = arith.constant 0 : index
    %33 = vector.load %arg3[%c56, %c0_18] : memref<72x16xbf16, #tpu.memory_space<vmem>>, vector<8x16xbf16>
    %cst_19 = arith.constant dense<0.000000e+00> : vector<16x16xf32>
    %34 = tpu.matmul %32, %33, %cst_19 {dimension_numbers = #tpu.dot_dimension_numbers<[1], [0], [0], [1], [0, 0, 1, 1], [], []>} : vector<16x8xbf16>, vector<8x16xbf16>, vector<16x16xf32> -> vector<16x16xf32>
    %35 = arith.addf %31, %34 : vector<16x16xf32>
    %36 = vector.extract_strided_slice %2 {offsets = [16, 0], sizes = [16, 8], strides = [1, 1]} : vector<32x8xbf16> to vector<16x8xbf16>
    %c64 = arith.constant 64 : index
    %c0_20 = arith.constant 0 : index
    %37 = vector.load %arg3[%c64, %c0_20] : memref<72x16xbf16, #tpu.memory_space<vmem>>, vector<8x16xbf16>
    %cst_21 = arith.constant dense<0.000000e+00> : vector<16x16xf32>
    %38 = tpu.matmul %36, %37, %cst_21 {dimension_numbers = #tpu.dot_dimension_numbers<[1], [0], [0], [1], [0, 0, 1, 1], [], []>} : vector<16x8xbf16>, vector<8x16xbf16>, vector<16x16xf32> -> vector<16x16xf32>
    %39 = arith.addf %35, %38 : vector<16x16xf32>
    %c0_22 = arith.constant 0 : index
    %c0_23 = arith.constant 0 : index
    %40 = vector.load %arg4[%c0_22, %c0_23] : memref<16x16xf32, #tpu.memory_space<vmem>>, vector<16x16xf32>
    tpu.vector_store %arg4[%c0_22, %c0_23], %39 {strides = array<i32>} : memref<16x16xf32, #tpu.memory_space<vmem>>, vector<16x16xf32>,
    %c0_i32 = arith.constant 0 : i32
    %41 = arith.cmpi eq, %arg0, %c0_i32 : i32
    %42 = arith.extui %41 : i1 to i32
    %c0_i32_24 = arith.constant 0 : i32
    %43 = arith.cmpi ne, %42, %c0_i32_24 : i32
    scf.if %43 {
      %cst_31 = arith.constant 0.000000e+00 : f32
      %53 = vector.broadcast %cst_31 : f32 to vector<2x16xf32>
      %c0_32 = arith.constant 0 : index
      %c0_33 = arith.constant 0 : index
      %54 = vector.load %arg5[%c0_32, %c0_33] : memref<2x16xf32, #tpu.memory_space<vmem>>, vector<2x16xf32>
      tpu.vector_store %arg5[%c0_32, %c0_33], %53 {strides = array<i32>} : memref<2x16xf32, #tpu.memory_space<vmem>>, vector<2x16xf32>,
    } else {
    }
    %c0_25 = arith.constant 0 : index
    %c0_26 = arith.constant 0 : index
    %44 = vector.load %arg5[%c0_25, %c0_26] : memref<2x16xf32, #tpu.memory_space<vmem>>, vector<2x16xf32>
    %cst_27 = arith.constant dense<0.000000e+00> : vector<16xf32>
    %45 = vector.multi_reduction <add>, %39, %cst_27 [0] : vector<16x16xf32> to vector<16xf32>
    %46 = vector.shape_cast %45 : vector<16xf32> to vector<1x16xf32>
    %47 = arith.mulf %39, %39 : vector<16x16xf32>
    %cst_28 = arith.constant dense<0.000000e+00> : vector<16xf32>
    %48 = vector.multi_reduction <add>, %47, %cst_28 [0] : vector<16x16xf32> to vector<16xf32>
    %49 = vector.shape_cast %48 : vector<16xf32> to vector<1x16xf32>
    %50 = tpu.concatenate %46, %49 in 0 : vector<1x16xf32>, vector<1x16xf32> -> vector<2x16xf32>
    %51 = arith.addf %44, %50 : vector<2x16xf32>
    %c0_29 = arith.constant 0 : index
    %c0_30 = arith.constant 0 : index
    %52 = vector.load %arg5[%c0_29, %c0_30] : memref<2x16xf32, #tpu.memory_space<vmem>>, vector<2x16xf32>
    tpu.vector_store %arg5[%c0_29, %c0_30], %51 {strides = array<i32>} : memref<2x16xf32, #tpu.memory_space<vmem>>, vector<2x16xf32>,
    return
  }
  func.func @transform_0(%arg0: i32) -> (i32, i32) {
    %c0_i32 = arith.constant 0 : i32
    %c0_i32_0 = arith.constant 0 : i32
    return %arg0, %c0_i32 : i32, i32
  }
  func.func @transform_1(%arg0: i32) -> (i32, i32) {
    %c1_i32 = arith.constant 1 : i32
    %0 = arith.addi %arg0, %c1_i32 : i32
    %c0_i32 = arith.constant 0 : i32
    %c0_i32_0 = arith.constant 0 : i32
    return %0, %c0_i32 : i32, i32
  }
  func.func @transform_2(%arg0: i32) -> (i32, i32) {
    %c0_i32 = arith.constant 0 : i32
    %c0_i32_0 = arith.constant 0 : i32
    %c0_i32_1 = arith.constant 0 : i32
    return %c0_i32, %c0_i32_0 : i32, i32
  }
  func.func @transform_3(%arg0: i32) -> (i32, i32) {
    %c0_i32 = arith.constant 0 : i32
    %c0_i32_0 = arith.constant 0 : i32
    return %arg0, %c0_i32 : i32, i32
  }
  func.func @transform_4(%arg0: i32) -> (i32, i32) {
    %c0_i32 = arith.constant 0 : i32
    %c0_i32_0 = arith.constant 0 : i32
    %c0_i32_1 = arith.constant 0 : i32
    return %c0_i32, %c0_i32_0 : i32, i32
  }
}

</mosaic_0001>

<bundles_post_ra>
// kernel: tpu_custom_call.1
= control target key start
LH: loop header
LB: loop body
LE: loop exit
PB: predicated region body
PF: predicated region fallthrough
CT: control target
= control target key end

     0   :  { %10 = vsyncpa [#allocation3], 0  ;;  %s1033_s15 = smov 0   ;;  %s1177_s0 = inlined_call_operand.vmem [shape: bf16[48,8], index: 0, kind: input, shape index: {}]   ;;  %s1178_s1 = inlined_call_operand.vmem [shape: bf16[48,8], index: 1, kind: input, shape index: {}]   ;;  %s1179_s2 = inlined_call_operand.vmem [shape: bf16[72,16], index: 2, kind: input, shape index: {}]   ;;  %s1180_s3 = inlined_call_operand.vmem [shape: f32[32,16], index: 3, kind: output, shape index: {0}]   ;;  %s1181_s4 = inlined_call_operand.hbm [shape: f32[2,16], index: 4, kind: output, shape index: {1}]  }
   0x1 LB: > { %s1039_s16 = sadd.s32 4294967295, %s1002_s15   ;;  %p851_p0 = scmp.ge.s32.totalorder %s1002_s15, 1  ;;  %s1002_s15 = sphi %s1033_s15, %s16_s15  }
   0x2   : > { %p177_p1 = scmp.lt.s32.totalorder %s1002_s15, 3 }
   0x4   : > { %p178_p2 = pnand %p851_p0, %p177_p1 }
   0x5   : > { %s1054_s21 = sshll.u32 (!%p178_p2), %s1039_s16, 1  ;;  %p869_p6 = scmp.ne.s32.totalorder (!%p178_p2), %s1039_s16, 0 }
   0x6   : > { %181 = sbr.rel (%p178_p2) target bundleno = 280 (0x118), region = 32  ;;  %p210_p3 = scmp.lt.s32.totalorder (!%p178_p2), %s1054_s21, 5 }
   0x7   : > { %s875_s22 = sadd.s32 (!%p178_p2), 2, %s1054_s21  ;;  %p224_p5 = scmp.lt.s32.totalorder (!%p178_p2), %s1054_s21, 3 }
   0x8   : > { %p217_p4 = scmp.lt.s32.totalorder (!%p178_p2), %s875_s22, 5 }
   0xb   : > { %v245_v0 = vld [vmem:[%s1179_s2 + $0x4] sm:$0xf]  ;;  %vm254_vm0 = vcmask 1043456   ;;  %v244_v1 = vld [vmem:[%s1179_s2] sm:$0xf]  ;;  %v1004_v2 = vmov 0.0  }
   0xc   : > { %894 = vmatprep.subr.bf16.mxu0 %v1004_v2  ;;  %v256_v3 = vsel %vm254_vm0, %v245_v0, 0  ;;  %900 = vmatprep.subr.bf16.mxu1 %v1004_v2  ;;  %v303_v4 = vsel %vm254_vm0, %v244_v1, 0  ;;  %vm1005_vm1 = vmmov 0   ;;  %s211_s23 = scalar_select %p210_p3, %s1054_s21, 5  ;;  %v400_v5 = vld [vmem:[%s1179_s2 + $0xc] sm:$0xf] }
   0xd   : > { %895 = vmatpush3.bf16.msra.mxu0 %v256_v3  ;;  %901 = vmatpush3.bf16.msra.mxu1 %v303_v4  ;;  %s1183_s22 = smov (!%p217_p4, %s875_s22), 5  ;;  %vm250_vm2 = vcmask 64512   ;;  %v346_v6 = vld [vmem:[%s1179_s2 + $0x8] sm:$0xf]  ;;  %v409_v8 = vsel %vm254_vm0, %v400_v5, 0  ;;  %vm246_vm3 = vcmask 1046528  }
   0xe   : > { %896 = vmatprep.mubr.msk.bf16.mxu0 %vm1005_vm1, %v1004_v2  ;;  %902 = vmatprep.mubr.msk.bf16.mxu1 %vm1005_vm1, %v1004_v2  ;;  %s853_s26 = sshll.u32 %s211_s23, 2  ;;  %s855_s30 = sshll.u32 %s1183_s22, 2  ;;  %v355_v14 = vsel %vm254_vm0, %v346_v6, 0  ;;  %vm401_vm4 = vcmask 1044480   ;;  %v508_v16 = vld [vmem:[%s1179_s2 + $0x14] sm:$0xf] }
   0xf   : > { %906 = vmatprep.subr.bf16.mxu0 %v1004_v2  ;;  %912 = vmatprep.subr.bf16.mxu1 %v1004_v2  ;;  %s213_s29 = scalar_lea.vmem %s1177_s0, %s853_s26  ;;  %s220_s9 = scalar_lea.vmem %s1178_s1, %s855_s30  ;;  %vm347_vm5 = vcmask 1045504   ;;  %v517_v20 = vsel %vm254_vm0, %v508_v16, 0  ;;  %v454_v21 = vld [vmem:[%s1179_s2 + $0x10] sm:$0xf]  ;;  %vm509_vm6 = vcmask 1042432   ;;  %vm617_vm7 = vcmask 1040384  }
  0x10   : > { %v1077_v7 = vld [vmem:[%s213_s29] sm:$0xff]   ;;  %v463_v25 = vsel %vm254_vm0, %v454_v21, 0  ;;  %v616_v26 = vld [vmem:[%s1179_s2 + $0x1c] sm:$0xf]  ;;  %v562_v31 = vld [vmem:[%s1179_s2 + $0x18] sm:$0xf] }
  0x11   : > { %v1080_v9 = vld [vmem:[%s220_s9] sm:$0xff]   ;;  %v247_v10 = vrot.slane %v1077_v7, 1  ;;  %903 = vmatmul.mubr.msk.bf16.vlgmr.msra.gmra.mxu1 %vm250_vm2, %v1077_v7  ;;  %v402_v12 = vrot.slane %v1077_v7, 3  ;;  %v348_v17 = vrot.slane %v1077_v7, 2  ;;  %v510_v23 = vrot.slane %v1077_v7, 5  ;;  %s1185_s21 = smov (!%p224_p5, %s1054_s21), 3 }
  0x12   : > { %v248_v11 = vrot.slane %v1080_v9, 1  ;;  %913 = vmatpush3.bf16.msra.mxu1 %v409_v8  ;;  %914 = vmatprep.mubr.msk.bf16.mxu1 %vm1005_vm1, %v1004_v2  ;;  %v403_v13 = vrot.slane %v1080_v9, 3  ;;  %v349_v18 = vrot.slane %v1080_v9, 2  ;;  %v511_v24 = vrot.slane %v1080_v9, 5  ;;  %v670_v39 = vld [vmem:[%s1179_s2 + $0x20] sm:$0xf] }
  0x13   : > { %924 = vmatprep.subr.bf16.mxu1 %v1004_v2  ;;  %v456_v27 = vrot.slane %v1077_v7, 4  ;;  %v457_v28 = vrot.slane %v1080_v9, 4  ;;  %v625_v30 = vsel %vm254_vm0, %v616_v26, 0  ;;  %v618_v33 = vrot.slane %v1077_v7, 7  ;;  %s857_s23 = sshll.u32 %s1185_s21, 3 }
  0x14   : > { %v249_v15 = vsel %vm246_vm3, %v247_v10, %v248_v11  ;;  %v404_v19 = vsel %vm401_vm4, %v402_v12, %v403_v13  ;;  %v350_v22 = vsel %vm347_vm5, %v348_v17, %v349_v18  ;;  %v512_v29 = vsel %vm509_vm6, %v510_v23, %v511_v24  ;;  %s227_s26 = scalar_lea.vmem %s1180_s3, %s857_s23 }
  0x15   : > { %897 = vmatmul.mubr.msk.bf16.vlgmr.msra.gmra.mxu0 %vm250_vm2, %v249_v15  ;;  %v458_v32 = vsel %vm254_vm0, %v456_v27, %v457_v28  ;;  %v619_v34 = vrot.slane %v1080_v9, 7  ;;  %v571_v35 = vsel %vm254_vm0, %v562_v31, 0  ;;  %v564_v36 = vrot.slane %v1077_v7, 6 }
  0x16   : > { %907 = vmatpush3.bf16.msra.mxu0 %v355_v14  ;;  %908 = vmatprep.mubr.msk.bf16.mxu0 %vm1005_vm1, %v1004_v2  ;;  %v565_v37 = vrot.slane %v1080_v9, 6  ;;  %vm563_vm8 = vcmask 1041408   ;;  %v675_v41 = vsel %vm254_vm0, %v670_v39, 0  ;;  %vm720_vm9 = vcmask 130048  }
  0x17   : > { %918 = vmatprep.subr.bf16.mxu0 %v1004_v2  ;;  %v620_v38 = vsel %vm617_vm7, %v618_v33, %v619_v34 }
  0x18   : > { %v566_v40 = vsel %vm563_vm8, %v564_v36, %v565_v37 }
  0x19   : > { %915 = vmatmul.mubr.msk.bf16.vlgmr.msra.gmra.mxu1 %vm250_vm2, %v404_v19 }
  0x1a   : > { %925 = vmatpush3.bf16.msra.mxu1 %v517_v20  ;;  %926 = vmatprep.mubr.msk.bf16.mxu1 %vm1005_vm1, %v1004_v2 }
  0x1b   : > { %936 = vmatprep.subr.bf16.mxu1 %v1004_v2 }
  0x1d   : > { %909 = vmatmul.mubr.msk.bf16.vlgmr.msra.gmra.mxu0 %vm250_vm2, %v350_v22 }
  0x1e   : > { %919 = vmatpush3.bf16.msra.mxu0 %v463_v25  ;;  %920 = vmatprep.mubr.msk.bf16.mxu0 %vm1005_vm1, %v1004_v2 }
  0x1f   : > { %930 = vmatprep.subr.bf16.mxu0 %v1004_v2 }
  0x21   : > { %927 = vmatmul.mubr.msk.bf16.vlgmr.msra.gmra.mxu1 %vm250_vm2, %v512_v29 }
  0x22   : > { %937 = vmatpush3.bf16.msra.mxu1 %v625_v30  ;;  %938 = vmatprep.mubr.msk.bf16.mxu1 %vm1005_vm1, %v1004_v2 }
  0x25   : > { %921 = vmatmul.mubr.msk.bf16.vlgmr.msra.gmra.mxu0 %vm250_vm2, %v458_v32 }
  0x26   : > { %931 = vmatpush3.bf16.msra.mxu0 %v571_v35  ;;  %932 = vmatprep.mubr.msk.bf16.mxu0 %vm1005_vm1, %v1004_v2 }
  0x27   : > { %942 = vmatprep.subr.bf16.mxu0 %v1004_v2 }
  0x29   : > { %939 = vmatmul.mubr.msk.bf16.vlgmr.msra.gmra.mxu1 %vm250_vm2, %v620_v38 }
  0x2d   : > { %933 = vmatmul.mubr.msk.bf16.vlgmr.msra.gmra.mxu0 %vm250_vm2, %v566_v40 }
  0x2e   : > { %943 = vmatpush3.bf16.msra.mxu0 %v675_v41  ;;  %944 = vmatprep.mubr.msk.bf16.mxu0 %vm1005_vm1, %v1004_v2 }
  0x35   : > { %945 = vmatmul.mubr.msk.bf16.vlgmr.msra.gmra.mxu0 %vm250_vm2, %v1080_v9 }
  0xd1   : > { %v339_v42 = vpop.f32.mrf.mxu1 }
  0xd3   : > { %v904_v43 = vpop.f32.mrf.mxu1 }
  0xd5   : > { %v292_v44 = vpop.f32.mrf.mxu0  ;;  %v342_v45 = vpop.f32.mrf.mxu1 }
  0xd6   : > { %v340_v58 = vadd.f32 %v339_v42, %v292_v44 }
  0xd7   : > { %v898_v46 = vpop.f32.mrf.mxu0  ;;  %v905_v47 = vpop.f32.mrf.mxu1 }
  0xd9   : > { %v295_v48 = vpop.f32.mrf.mxu0  ;;  %v445_v49 = vpop.f32.mrf.mxu1 }
  0xda   : > { %v343_v0 = vadd.f32 %v342_v45, %v295_v48 }
  0xdb   : > { %v899_v50 = vpop.f32.mrf.mxu0  ;;  %v916_v51 = vpop.f32.mrf.mxu1 }
  0xdd   : > { %v391_v52 = vpop.f32.mrf.mxu0  ;;  %v448_v53 = vpop.f32.mrf.mxu1 }
  0xde   : > { %v398_v61 = vadd.f32 %v391_v52, %v340_v58 }
  0xdf   : > { %v910_v54 = vpop.f32.mrf.mxu0  ;;  %v917_v55 = vpop.f32.mrf.mxu1 }
  0xe0   : > { %v452_v3 = vadd.f32 %v445_v49, %v398_v61 }
  0xe1   : > { %v394_v56 = vpop.f32.mrf.mxu0  ;;  %v553_v57 = vpop.f32.mrf.mxu1 }
  0xe2   : > { %v399_v4 = vadd.f32 %v394_v56, %v343_v0 }
  0xe3   : > { %v911_v59 = vpop.f32.mrf.mxu0  ;;  %v928_v60 = vpop.f32.mrf.mxu1 }
  0xe4   : > { %v453_v10 = vadd.f32 %v448_v53, %v399_v4 }
  0xe5   : > { %v499_v62 = vpop.f32.mrf.mxu0  ;;  %v556_v63 = vpop.f32.mrf.mxu1 }
  0xe6   : > { %v506_v7 = vadd.f32 %v499_v62, %v452_v3 }
  0xe7   : > { %v922_v1 = vpop.f32.mrf.mxu0  ;;  %v929_v2 = vpop.f32.mrf.mxu1 }
  0xe8   : > { %v560_v13 = vadd.f32 %v553_v57, %v506_v7 }
  0xe9   : > { %v502_v5 = vpop.f32.mrf.mxu0  ;;  %v661_v6 = vpop.f32.mrf.mxu1 }
  0xea   : > { %v507_v14 = vadd.f32 %v502_v5, %v453_v10 }
  0xeb   : > { %v923_v8 = vpop.f32.mrf.mxu0  ;;  %v940_v9 = vpop.f32.mrf.mxu1 }
  0xec   : > { %v561_v19 = vadd.f32 %v556_v63, %v507_v14 }
  0xed   : > { %v607_v11 = vpop.f32.mrf.mxu0  ;;  %v664_v12 = vpop.f32.mrf.mxu1 }
  0xee   : > { %v614_v17 = vadd.f32 %v607_v11, %v560_v13 }
  0xef   : > { %v934_v15 = vpop.f32.mrf.mxu0  ;;  %v941_v16 = vpop.f32.mrf.mxu1 }
  0xf0   : > { %v668_v21 = vadd.f32 %v661_v6, %v614_v17 }
  0xf1   : > { %v610_v18 = vpop.f32.mrf.mxu0 }
  0xf2   : > { %v615_v22 = vadd.f32 %v610_v18, %v561_v19 }
  0xf3   : > { %v935_v20 = vpop.f32.mrf.mxu0 }
  0xf4   : > { %v669_v26 = vadd.f32 %v664_v12, %v615_v22 }
  0xf5   : > { %v711_v23 = vpop.f32.mrf.mxu0 }
  0xf6   : > { %v718_v24 = vadd.f32 %v711_v23, %v668_v21 }
  0xf7   : > { %v946_v25 = vpop.f32.mrf.mxu0 }
  0xf8   : > { %721 = vst.msk [vmem:[%s227_s26] sm:$0xff] %vm720_vm9, %v718_v24  ;;  %726 = sbr.rel (%p869_p6) target bundleno = 255 (0xff), region = 36 }
  0xf9   : > { %v714_v27 = vpop.f32.mrf.mxu0 }
  0xfa   : > { %v719_v28 = vadd.f32 %v714_v27, %v669_v26 }
  0xfb   : > { %v947_v29 = vpop.f32.mrf.mxu0 }
  0xfc   : > { %722 = vst.msk [vmem:[%s227_s26 + $0x8] sm:$0xff] %vm720_vm9, %v719_v28 }
  0xfd   : > { %vm727_vm10 = vcmask 123904   ;;  %v1006_v30 = vmov 0.0  }
  0xfe   : > { %728 = vst.msk [vmem:[#allocation2] sm:$0x3] %vm727_vm10, %v1006_v30 }
  0xff PF: > { %v730_v31 = vsel %vm720_vm9, %v718_v24, 0.0  ;;  %v731_v32 = vsel %vm720_vm9, %v719_v28, 0.0  ;;  %v739_v33 = vmul.f32 %v718_v24, %v718_v24  ;;  %v740_v34 = vmul.f32 %v719_v28, %v719_v28  ;;  %s1007_s21 = smov [#allocation2]   ;;  %p952_p7 = scmp.eq.s32.totalorder %s1039_s16, 1 }
 0x100   : > { %v732_v35 = vadd.f32 %v731_v32, %v730_v31  ;;  %s771_s27 = sshll.u32 %s1007_s21, 4  ;;  %vm753_vm11 = vcmask 123904   ;;  %s772_s27 = int_to_ptr.vmem [resolvable:$true] %s771_s27 }
 0x101   : > { %v741_v36 = vsel %vm720_vm9, %v739_v33, 0.0  ;;  %v742_v37 = vsel %vm720_vm9, %v740_v34, 0.0  ;;  %s968_s28 = scalar_lea.vmem %s772_s27, 32  ;;  %p975_p11 = scmp.lt.s32.totalorder %s772_s27, %s772_s27 }
 0x102   : > { %v733_v38 = vrot.slane %v732_v35, 4  ;;  %v743_v39 = vadd.f32 %v742_v37, %v741_v36  ;;  %p969_p8 = scmp.ne.s32.totalorder %s772_s27, %s968_s28  ;;  %p976_p12 = scmp.lt.s32.totalorder %s968_s28, %s968_s28 }
 0x104   : > { %v734_v40 = vadd.f32 %v733_v38, %v732_v35  ;;  %v744_v41 = vrot.slane %v743_v39, 4  ;;  %p970_p9 = pnand %p969_p8, %p952_p7  ;;  %p977_p13 = por %p976_p12, %p975_p11 }
 0x105   : > { %v729_v50 = vld [vmem:[#allocation2] sm:$0x3] }
 0x106   : > { %v735_v42 = vrot.slane %v734_v40, 2  ;;  %v745_v43 = vadd.f32 %v744_v41, %v743_v39  ;;  %p971_p10 = pneg %p970_p9 }
 0x108   : > { %v736_v44 = vadd.f32 %v735_v42, %v734_v40  ;;  %v746_v45 = vrot.slane %v745_v43, 2  ;;  %p978_p0 = pnand %p977_p13, %p971_p10 }
 0x10a   : > { %v737_v46 = vrot.slane %v736_v44, 1  ;;  %v747_v47 = vadd.f32 %v746_v45, %v745_v43 }
 0x10c   : > { %v738_v48 = vadd.f32 %v737_v46, %v736_v44  ;;  %v748_v49 = vrot.slane %v747_v47, 1 }
 0x10e   : > { %v749_v51 = vadd.f32 %v748_v49, %v747_v47 }
 0x110   : > { %v751_v52 = vsel %vm617_vm7, %v738_v48, %v749_v51 }
 0x111   : > { %v752_v53 = vadd.f32 %v751_v52, %v729_v50 }
 0x113   : > { %754 = vst.msk [vmem:[#allocation2] sm:$0x3] %vm753_vm11, %v752_v53 }
 0x114   : > { %981 = shalt.err (!%p978_p0)
}
 0x115   : > { %949 = dma.vmem_to_hbm [thread:$0]  (%p952_p7), %s772_s27, 32, %s1181_s4, [#allocation3]  }
 0x116   : > { %997 = dma.done.wait (%p952_p7), [#allocation3], 32  }
 0x117   : > { %999 = vsyncadd (%p952_p7), [#allocation3], 4294967264 }
 0x118 PF: > { %s16_s15 = sadd.s32 1, %s1002_s15  }
 0x119   : > { %p13_p1 = scmp.ge.s32.totalorder %s16_s15, 4  }
 0x11b   :  { %15 = sbr.rel (!%p13_p1) target bundleno = 1 (0x1), region = 78 }
 0x120   :  { %792 = vsyncpa [#allocation3], 1 }
 0x121   :  { %794 = vsyncpa [#allocation3 + $0x1], 1 }

</bundles_post_ra>
